<compile_context>
chip_gen: v7x
topology: tpu7x:2x2x1
jax: 0.10.0
libtpu: 0.0.40
codegen_flags: <defaults>
</compile_context>

<pallas_src>
import jax
import jax.numpy as jnp
from jax.experimental import pallas as pl
from jax.experimental.pallas import tpu as pltpu


def _repeat_kernel(x_ref, o_ref):
    # x_ref: (1, *blk)    o_ref: (1, R, *blk)
    # Write the input block into each of the R repeat slots.  x_ref is re-read
    # per store (vld slots are plentiful); hoisting it would create a
    # block-sized live value and risk vreg spills spanning all R stores.
    for j in range(o_ref.shape[1]):
        o_ref[0, j] = x_ref[0]


def _vmem_capacity_bytes(default=64 * 1024 * 1024):
    """Physical VMEM of the attached TPU (conservative default if unknown)."""
    try:
        info = pltpu.get_tpu_info()
        for name in ("vmem_capacity_bytes", "vmem_size_bytes", "vmem_bytes"):
            v = getattr(info, name, None)
            if v:
                return int(v)
    except Exception:
        pass
    return default


def _pick_tile(extent, quantum, footprint_per_elem, out_per_elem,
               footprint_budget, target_out_bytes):
    """Pick a tile size (multiple of `quantum`) along a dim of size `extent`.

    footprint_per_elem: VMEM bytes per tile element (double-buffered in+out).
    out_per_elem:       output-block bytes per tile element (DMA fatness).
    Sized by bytes: aim for ~target_out_bytes per output block, clamped by the
    VMEM footprint budget (NOT by a fixed lane count).
    """
    max_by_vmem = max(1, footprint_budget // max(1, footprint_per_elem))
    by_target = max(1, target_out_bytes // max(1, out_per_elem))
    budget = max(quantum, (min(max_by_vmem, by_target) // quantum) * quantum)
    if extent <= budget:
        return extent                      # full extent: fattest, always legal
    # Prefer the largest multiple-of-quantum divisor (no masked edge tile) as
    # long as it is not much smaller than the byte budget.
    best_div = None
    t = quantum
    while t <= budget:
        if extent % t == 0:
            best_div = t
        t += quantum
    if best_div is not None and 2 * best_div >= budget:
        return best_div
    # Otherwise pick a near-budget tile minimizing the masked remainder.
    best_t, best_waste = budget, (-extent) % budget
    t = max(quantum, ((budget // 2) // quantum) * quantum)
    while t <= budget:
        waste = (-extent) % t
        if waste < best_waste:
            best_t, best_waste = t, waste
        t += quantum
    return best_t


def _ensure_min_steps(extent, tile, quantum, n_outer, out_per_elem,
                      min_steps=4, min_out_bytes=256 * 1024):
    """Shrink `tile` (keeping blocks fat) so the grid has enough steps for
    DMA/compute pipelining and for v7x's two TensorCores."""
    n_tiles = -(-extent // tile)
    while n_outer * n_tiles < min_steps:
        new_tile = max(quantum, ((tile // 2) // quantum) * quantum)
        if new_tile >= tile or new_tile * out_per_elem < min_out_bytes:
            break
        tile = new_tile
        n_tiles = -(-extent // tile)
    return tile


def ibroadcast_forward(x, out_channels, *,
                       target_out_block_bytes=4 * 1024 * 1024):
    """x: (N, C, D, H, W) -> (N, out_channels, D, H, W) via channel repeat."""
    N, C, D, H, W = x.shape
    if out_channels % C != 0:
        raise Exception(
            f"Cannot broadcast {C} in_channels to {out_channels} out_channels")
    R = out_channels // C
    S = D * H * W
    L = C * S
    itemsize = jnp.dtype(x.dtype).itemsize

    # Per-generation VMEM budgets: v7x has only 64 MiB physical (keep the
    # scoped limit well under it); v5e/v6e have 128 MiB physical but small
    # scoped defaults (16/32 MiB), so raise the limit explicitly and give
    # roughly half of it to live (double-buffered) blocks.
    vmem_cap = _vmem_capacity_bytes()
    vmem_limit = int(min(vmem_cap * 0.7, 96 * 1024 * 1024))
    footprint_budget = vmem_limit // 2

    compiler_params = pltpu.CompilerParams(
        dimension_semantics=("parallel", "parallel"),
        vmem_limit_bytes=vmem_limit)

    if L % 128 == 0:
        # Lane+sublane-dense path: flatten the per-batch slab to (rows, 128) so
        # tiles are dense vregs even when C is tiny / not 8-16-32 aligned.
        rows = L // 128
        sub = max(1, 32 // itemsize)        # sublane quantum: 8/16/32 f32/bf16/i8
        row_t = _pick_tile(
            rows, sub,
            footprint_per_elem=2 * (1 + R) * 128 * itemsize,
            out_per_elem=R * 128 * itemsize,
            footprint_budget=footprint_budget,
            target_out_bytes=target_out_block_bytes)
        row_t = _ensure_min_steps(rows, row_t, sub, N, R * 128 * itemsize)
        n_t = pl.cdiv(rows, row_t)
        x3 = x.reshape(N, rows, 128)
        out = pl.pallas_call(
            _repeat_kernel,
            out_shape=jax.ShapeDtypeStruct((N, R, rows, 128), x.dtype),
            grid_spec=pltpu.PrefetchScalarGridSpec(
                num_scalar_prefetch=0,
                grid=(N, n_t),
                in_specs=[pl.BlockSpec((1, row_t, 128),
                                       lambda n, s: (n, s, 0))],
                out_specs=pl.BlockSpec((1, R, row_t, 128),
                                       lambda n, s: (n, 0, s, 0)),
            ),
            compiler_params=compiler_params,
        )(x3)
    else:
        # Fallback for L % 128 != 0: tile (N, C, S) over S; ragged / sub-(8,128)
        # edges are handled by Pallas write masking.
        # TODO(synk): also tile C (or pad S in the wrapper) if C alone
        # overflows the VMEM budget or R is astronomically large.
        x2 = x.reshape(N, C, S)
        S_t = _pick_tile(
            S, 128,
            footprint_per_elem=2 * (1 + R) * C * itemsize,
            out_per_elem=R * C * itemsize,
            footprint_budget=footprint_budget,
            target_out_bytes=target_out_block_bytes)
        S_t = _ensure_min_steps(S, S_t, 128, N, R * C * itemsize)
        n_t = pl.cdiv(S, S_t)
        out = pl.pallas_call(
            _repeat_kernel,
            out_shape=jax.ShapeDtypeStruct((N, R, C, S), x.dtype),
            grid_spec=pltpu.PrefetchScalarGridSpec(
                num_scalar_prefetch=0,
                grid=(N, n_t),
                in_specs=[pl.BlockSpec((1, C, S_t),
                                       lambda n, s: (n, 0, s))],
                out_specs=pl.BlockSpec((1, R, C, S_t),
                                       lambda n, s: (n, 0, 0, s)),
            ),
            compiler_params=compiler_params,
        )(x2)

    # (N, R, ...) contiguous layout == torch repeat(1, R, 1, 1, 1) ordering.
    return out.reshape(N, R * C, D, H, W)


if __name__ == "__main__":
    key = jax.random.PRNGKey(0)

    # Main (lane+sublane-dense) path: C*S = 1024, a multiple of 128.
    N, C, D, H, W = 2, 4, 2, 8, 16
    out_channels = 8                     # repeat_count = 2
    x = jax.random.normal(key, (N, C, D, H, W), dtype=jnp.float32)
    ref = jnp.tile(x, (1, out_channels // C, 1, 1, 1))
    out = jax.block_until_ready(ibroadcast_forward(x, out_channels))
    assert out.shape == (N, out_channels, D, H, W)
    assert jnp.array_equal(out, ref)

    # Fallback path: C*S = 3*80 = 240, not a multiple of 128.
    x_odd = jax.random.normal(key, (2, 3, 2, 4, 10), dtype=jnp.float32)
    ref_odd = jnp.tile(x_odd, (1, 2, 1, 1, 1))
    out_odd = jax.block_until_ready(ibroadcast_forward(x_odd, 6))
    assert out_odd.shape == (2, 6, 2, 4, 10)
    assert jnp.array_equal(out_odd, ref_odd)

    print("KERNEL_OK")
</pallas_src>

<mosaic_0001>
module attributes {stable_mosaic.version = 11 : i64} {
  func.func @_repeat_kernel(%arg0: i32, %arg1: i32, %arg2: memref<1x8x128xf32, #tpu.memory_space<vmem>>, %arg3: memref<1x2x8x128xf32, #tpu.memory_space<vmem>>) attributes {dimension_semantics = [#tpu.dimension_semantics<parallel>, #tpu.dimension_semantics<parallel>], iteration_bounds = array<i64: 2, 1>, scalar_prefetch = 0 : i64, scratch_operands = 0 : i64, tpu.core_type = #tpu.core_type<tc>, window_params = [{transform_indices = @transform_0, window_bounds = array<i64: 1, 8, 128>}, {transform_indices = @transform_1, window_bounds = array<i64: 1, 2, 8, 128>}]} {
    %c0 = arith.constant 0 : index
    %c0_0 = arith.constant 0 : index
    %c0_1 = arith.constant 0 : index
    %0 = vector.load %arg2[%c0, %c0_0, %c0_1] : memref<1x8x128xf32, #tpu.memory_space<vmem>>, vector<1x8x128xf32>
    %1 = vector.shape_cast %0 : vector<1x8x128xf32> to vector<8x128xf32>
    %c0_2 = arith.constant 0 : index
    %c0_3 = arith.constant 0 : index
    %c0_4 = arith.constant 0 : index
    %c0_5 = arith.constant 0 : index
    %2 = vector.load %arg3[%c0_2, %c0_3, %c0_4, %c0_5] : memref<1x2x8x128xf32, #tpu.memory_space<vmem>>, vector<1x1x8x128xf32>
    %3 = vector.shape_cast %2 : vector<1x1x8x128xf32> to vector<8x128xf32>
    %4 = vector.shape_cast %1 : vector<8x128xf32> to vector<1x1x8x128xf32>
    tpu.vector_store %arg3[%c0_2, %c0_3, %c0_4, %c0_5], %4 {strides = array<i32>} : memref<1x2x8x128xf32, #tpu.memory_space<vmem>>, vector<1x1x8x128xf32>,
    %c0_6 = arith.constant 0 : index
    %c0_7 = arith.constant 0 : index
    %c0_8 = arith.constant 0 : index
    %5 = vector.load %arg2[%c0_6, %c0_7, %c0_8] : memref<1x8x128xf32, #tpu.memory_space<vmem>>, vector<1x8x128xf32>
    %6 = vector.shape_cast %5 : vector<1x8x128xf32> to vector<8x128xf32>
    %c0_9 = arith.constant 0 : index
    %c1 = arith.constant 1 : index
    %c0_10 = arith.constant 0 : index
    %c0_11 = arith.constant 0 : index
    %7 = vector.load %arg3[%c0_9, %c1, %c0_10, %c0_11] : memref<1x2x8x128xf32, #tpu.memory_space<vmem>>, vector<1x1x8x128xf32>
    %8 = vector.shape_cast %7 : vector<1x1x8x128xf32> to vector<8x128xf32>
    %9 = vector.shape_cast %6 : vector<8x128xf32> to vector<1x1x8x128xf32>
    tpu.vector_store %arg3[%c0_9, %c1, %c0_10, %c0_11], %9 {strides = array<i32>} : memref<1x2x8x128xf32, #tpu.memory_space<vmem>>, vector<1x1x8x128xf32>,
    return
  }
  func.func @transform_0(%arg0: i32, %arg1: i32) -> (i32, i32, i32) {
    %c0_i32 = arith.constant 0 : i32
    %c0_i32_0 = arith.constant 0 : i32
    return %arg0, %arg1, %c0_i32 : i32, i32, i32
  }
  func.func @transform_1(%arg0: i32, %arg1: i32) -> (i32, i32, i32, i32) {
    %c0_i32 = arith.constant 0 : i32
    %c0_i32_0 = arith.constant 0 : i32
    %c0_i32_1 = arith.constant 0 : i32
    return %arg0, %c0_i32, %arg1, %c0_i32_0 : i32, i32, i32, i32
  }
}

</mosaic_0001>

<bundles_post_ra>
// kernel: tpu_custom_call.1
= control target key start
LH: loop header
LB: loop body
LE: loop exit
PB: predicated region body
PF: predicated region fallthrough
CT: control target
= control target key end

     0   :  { %6 = vsyncpa [#allocation3], 0  ;;  %s636_s0 = inlined_call_operand.hbm [shape: f32[2,8,128], index: 0, kind: input, shape index: {}]   ;;  %s637_s1 = inlined_call_operand.hbm [shape: f32[2,2,8,128], index: 1, kind: output, shape index: {}]  }
   0x1   :  { %8 = vsyncpa [#allocation3 + $0x1], 0 }
   0x2   :  { %9 = vsyncpa [#allocation4], 0 }
   0x3   :  { %11 = vsyncpa [#allocation4 + $0x1], 0  ;;  %s461_s6 = smov 0   ;;  %s463_s7 = smov 0  }
   0x4   :  { %s465_s8 = smov 0   ;;  %s467_s9 = smov 0  }
   0x5   :  { %s469_s10 = smov 0   ;;  %s471_s11 = smov 0  }
   0x6 LB: > { %s253_s12 = sadd.s32 4294967295, %s445_s11   ;;  %s254_s13 = sadd.s32 4294967294, %s445_s11   ;;  %s445_s11 = sphi %s471_s11, %s17_s11   ;;  %s441_s10 = sphi %s469_s10, %s653_s10   ;;  %s437_s9 = sphi %s467_s9, %s652_s9   ;;  %s433_s8 = sphi %s465_s8, %s651_s8   ;;  %s429_s7 = sphi %s463_s7, %s650_s7   ;;  %s425_s6 = sphi %s461_s6, %s649_s6  }
   0x7   : > { %s29_s14 = sadd.s32 1, %s441_s10  ;;  %s38_s15 = sadd.s32 1, %s433_s8 }
   0x8   : > { %p31_p0 = scmp.ge.s32.totalorder %s29_s14, 2  ;;  %p45_p1 = scmp.ne.s32.totalorder %s433_s8, %s429_s7 }
   0x9   : > { %p46_p2 = scmp.eq.s32.totalorder %s445_s11, 0  ;;  %p51_p3 = scmp.ne.s32.totalorder %s429_s7, %s425_s6 }
   0xa   : > { %s655_s14 = smov (%p31_p0, %s29_s14), 0  ;;  %p52_p5 = scmp.eq.s32.totalorder %s253_s12, 0 }
   0xb   : > { %p502_p4 = por %p46_p2, %p45_p1  ;;  %s33_s17 = ssub.s32 %s441_s10, %s655_s14 }
   0xc   : > { %p77_p6 = scmp.eq.s32.totalorder %s253_s12, 1  ;;  %p36_p7 = scmp.eq.s32.totalorder %s33_s17, 0 }
   0xd   : > { %p508_p8 = por %p52_p5, %p51_p3  ;;  %p83_p10 = scmp.eq.s32.totalorder %s254_s13, 1 }
   0xe   : > { %p512_p9 = por %p77_p6, %p45_p1  ;;  %p281_p13 = scmp.lt.s32.totalorder %s445_s11, 2 }
   0xf   : > { %s517_s20 = scalar_select %p36_p7, %s433_s8, %s38_s15  }
  0x10   : > { %s641_s19 = scalar_select %p512_p9, 1, 0 }
  0x11   : > { %p519_p11 = por %p83_p10, %p51_p3  ;;  %s103_s22 = sand.u32 1, %s433_s8  }
  0x12   : > { %s257_s23 = sshll.u32 %s103_s22, 3  ;;  %s258_s24 = sshll.u32 %s441_s10, 7 }
  0x13   : > { %s642_s21 = scalar_select %p519_p11, 1, 0 }
  0x14   : > { %s530_s27 = scalar_lea.hbm %s636_s0, %s258_s24  ;;  %s107_s28 = scalar_lea.vmem [#allocation2], %s257_s23 }
  0x15   : > { %s115_s29 = sshll.u32 %s107_s28, 4  ;;  %p536_p0 = pnand %p281_p13, %p502_p4  ;;  %s532_s29 = int_to_ptr.vmem [resolvable:$true] %s115_s29 }
  0x16   : > { %s104_s2 = scalar_lea.sflag [#allocation3], %s103_s22  ;;  %s333_s3 = scalar_lea.hbm %s530_s27, 128 }
  0x17   : > { %p334_p3 = scmp.ne.s32.totalorder %s530_s27, %s333_s3  ;;  %p335_p5 = pneg %p536_p0 }
  0x18   : > { %s338_s12 = scalar_lea.hbm %s636_s0, 256  ;;  %p339_p4 = scmp.lt.u32.totalorder %s530_s27, %s636_s0 }
  0x19   : > { %p336_p6 = pnand %p335_p5, %p334_p3  ;;  %p340_p10 = scmp.lt.u32.totalorder %s338_s12, %s333_s3 }
  0x1a   : > { %p342_p12 = scmp.lt.u32.totalorder %s333_s3, %s530_s27 }
  0x1b   : > { %p337_p7 = pneg %p336_p6  ;;  %p341_p13 = por %p340_p10, %p339_p4 }
  0x1d   : > { %p343_p1 = por %p342_p12, %p341_p13 }
  0x1f   : > { %p344_p2 = pnand %p343_p1, %p337_p7 }
  0x21   : > { %347 = shalt.err (!%p344_p2)
}
  0x22   : > { %s348_s16 = scalar_lea.vmem %s532_s29, 128  ;;  %s447_s17 = smov [#allocation2]  }
  0x23   : > { %p349_p3 = scmp.ne.s32.totalorder %s532_s29, %s348_s16  ;;  %s353_s22 = sshll.u32 %s447_s17, 4  ;;  %s354_s22 = int_to_ptr.vmem [resolvable:$false] %s353_s22 }
  0x24   : > { %s355_s23 = scalar_lea.vmem %s354_s22, 256  ;;  %p356_p9 = scmp.lt.s32.totalorder %s532_s29, %s354_s22 }
  0x25   : > { %p351_p6 = pnand %p349_p3, %p335_p5  ;;  %p357_p4 = scmp.lt.s32.totalorder %s355_s23, %s348_s16 }
  0x27   : > { %p352_p11 = pneg %p351_p6  ;;  %p358_p10 = por %p357_p4, %p356_p9 }
  0x29   : > { %p359_p12 = pnand %p358_p10, %p352_p11 }
  0x2b   : > { %362 = shalt.err (!%p359_p12)
}
  0x2c   : > { %276 = dma.hbm_to_vmem [thread:$0]  (!%p536_p0), %s530_s27, 128, %s532_s29, %s104_s2  }
  0x2d   : > { %p644_p1 = scmp.lt.s32.totalorder %s445_s11, 3  ;;  %p645_p2 = scmp.ge.s32.totalorder %s445_s11, 1 }
  0x2f   : > { %p121_p5 = pnand %p645_p2, %p644_p1 }
  0x30   : > { %s572_s24 = sand.u32 (!%p121_p5), 1, %s429_s7  }
  0x31   : > { %124 = sbr.rel (%p121_p5) target bundleno = 84 (0x54), region = 24  ;;  %s260_s25 = sshll.u32 (!%p121_p5), %s572_s24, 3 }
  0x32   : > { %s127_s26 = scalar_lea.sflag (!%p121_p5), [#allocation3], %s572_s24  ;;  %s130_s28 = scalar_lea.vmem (!%p121_p5), [#allocation2], %s260_s25 }
  0x38   : > { %416 = dma.done.wait (%p508_p8), %s127_s26, 128  }
  0x39   : > { %418 = vsyncadd (%p508_p8), %s127_s26, 4294967168  ;;  %s261_s27 = sshll.u32 %s572_s24, 4  ;;  %s268_s2 = sshll.u32 %s437_s9, 8  ;;  %v149_v0 = vld [vmem:[%s130_s28] sm:$0xff] }
  0x3a   : > { %s148_s29 = scalar_lea.vmem [#allocation5], %s261_s27  ;;  %s587_s5 = scalar_lea.hbm %s637_s1, %s268_s2 }
  0x3b   : > { %s169_s30 = sshll.u32 %s148_s29, 4  ;;  %150 = vst [vmem:[%s148_s29] sm:$0xff] %v149_v0  ;;  %262 = vst [vmem:[%s148_s29 + $0x8] sm:$0xff] %v149_v0  ;;  %s155_s18 = scalar_lea.sflag [#allocation4], %s572_s24  ;;  %s582_s30 = int_to_ptr.vmem [resolvable:$true] %s169_s30 }
  0x3c   : > { %s363_s12 = scalar_lea.vmem %s582_s30, 256  ;;  %p646_p9 = scmp.ne.s32.totalorder %s641_s19, 0 }
  0x3d   : > { %p364_p8 = scmp.ne.s32.totalorder %s582_s30, %s363_s12  ;;  %s448_s9 = smov [#allocation5]  }
  0x3e   : > { %s367_s13 = sshll.u32 %s448_s9, 4  ;;  %s368_s13 = int_to_ptr.vmem [resolvable:$false] %s367_s13 }
  0x3f   : > { %p365_p11 = pnand %p364_p8, %p646_p9  ;;  %s369_s15 = scalar_lea.vmem %s368_s13, 512 }
  0x40   : > { %p370_p7 = scmp.lt.s32.totalorder %s582_s30, %s368_s13  ;;  %p371_p13 = scmp.lt.s32.totalorder %s369_s15, %s363_s12 }
  0x41   : > { %p366_p0 = pneg %p365_p11 }
  0x42   : > { %p372_p3 = por %p371_p13, %p370_p7 }
  0x44   : > { %p373_p6 = pnand %p372_p3, %p366_p0 }
  0x46   : > { %376 = shalt.err (!%p373_p6)
}
  0x47   : > { %s377_s16 = scalar_lea.hbm %s587_s5, 256  ;;  %s381_s23 = scalar_lea.hbm %s637_s1, 512 }
  0x48   : > { %p378_p4 = scmp.ne.s32.totalorder %s587_s5, %s377_s16  ;;  %p382_p1 = scmp.lt.u32.totalorder %s587_s5, %s637_s1 }
  0x49   : > { %p383_p2 = scmp.lt.u32.totalorder %s381_s23, %s377_s16  ;;  %p385_p8 = scmp.lt.u32.totalorder %s377_s16, %s587_s5 }
  0x4a   : > { %p379_p10 = pnand %p378_p4, %p646_p9 }
  0x4b   : > { %p384_p5 = por %p383_p2, %p382_p1 }
  0x4c   : > { %p380_p12 = pneg %p379_p10 }
  0x4d   : > { %p386_p11 = por %p385_p8, %p384_p5 }
  0x4f   : > { %p387_p0 = pnand %p386_p11, %p380_p12 }
  0x51   : > { %390 = shalt.err (!%p387_p0)
}
  0x52   : > { %s449_s28 = smov 128   ;;  %s450_s27 = smov 8  }
  0x53   : > { %271 = dma.vmem_to_hbm [thread:$0]  (%p646_p9), %s582_s30, 256, %s587_s5, %s155_s18, %s449_s28, %s449_s28, %s450_s27  }
  0x54 PF: > { %s184_s29 = sand.u32 1, %s425_s6   ;;  %p647_p7 = scmp.ne.s32.totalorder %s642_s21, 0 }
  0x55   : > { %p648_p13 = scmp.ge.s32.totalorder %s445_s11, 2  ;;  %s185_s2 = scalar_lea.sflag [#allocation4], %s184_s29 }
  0x57   : > { %p278_p3 = pnand %p648_p13, %p647_p7 }
  0x59   : > { %420 = dma.done.wait (!%p278_p3), %s185_s2, 256  }
  0x5a   : > { %422 = vsyncadd (!%p278_p3), %s185_s2, 4294967040  ;;  %s17_s11 = sadd.s32 1, %s445_s11   ;;  %s649_s6 = smov %s429_s7 }
  0x5b   : > { %p14_p6 = scmp.ge.s32.totalorder %s17_s11, 4   ;;  %s650_s7 = smov %s433_s8 }
  0x5c   : > { %s651_s8 = smov %s517_s20  ;;  %s652_s9 = smov %s441_s10 }
  0x5d   : > { %s653_s10 = smov %s655_s14  ;;  %16 = sbr.rel (!%p14_p6) target bundleno = 6 (0x6), region = 70 }
  0x64   :  { %190 = vsyncpa [#allocation3], 1 }
  0x65   :  { %192 = vsyncpa [#allocation3 + $0x1], 1 }
  0x66   :  { %193 = vsyncpa [#allocation4], 1 }
  0x67   :  { %195 = vsyncpa [#allocation4 + $0x1], 1 }

</bundles_post_ra>
